<compile_context>
chip_gen: v7x
topology: tpu7x:2x2x1
jax: 0.10.0
libtpu: 0.0.40
codegen_flags: <defaults>
</compile_context>

<pallas_src>
from functools import partial

import jax
import jax.numpy as jnp
from jax.experimental import pallas as pl
from jax.experimental.pallas import tpu as pltpu

_EPS = 1e-5
_MIB = 1024 * 1024


def _round_up(n, m=128):
    return ((n + m - 1) // m) * m


def _tpu_vmem_capacity_bytes():
    """Generation-aware VMEM capacity (128 MiB v5e/v6e, 64 MiB v7x); safe fallback."""
    try:
        info = pltpu.get_tpu_info()
        cap = int(getattr(info, "vmem_capacity_bytes", 0))
        if cap > 0:
            return cap
    except Exception:
        pass
    return 64 * _MIB  # conservative (v7x-sized) default


# ---------------------------------------------------------------------------
# Shared per-layer math (values, not refs): Linear (x @ Wt) + bias -> ReLU -> BN.
# Matmul in bf16 with f32 accumulation; elementwise / BN math in f32.
# ---------------------------------------------------------------------------
def _layer_body(h, wt, b, gamma, beta, inv_batch, eps, out_dtype):
    y = jnp.dot(h.astype(wt.dtype), wt, preferred_element_type=jnp.float32)
    y = jnp.maximum(y + b, 0.0)                      # bias + ReLU (always applied, see NOTE)
    # Dropout p=0.0 -> identity.
    # BatchNorm1d (training mode): biased variance, centered two-pass (no cancellation).
    mean = jnp.sum(y, axis=0, keepdims=True) * inv_batch
    c = y - mean
    var = jnp.sum(c * c, axis=0, keepdims=True) * inv_batch
    y_hat = c * jax.lax.rsqrt(var + eps)             # rsqrt -> EUP
    return (y_hat * gamma + beta).astype(out_dtype)


# ---------------------------------------------------------------------------
# Fused whole-stack kernel: activation stays resident in VMEM; weights are
# streamed from HBM through a double-buffered VMEM scratch (manual DMA).
# ---------------------------------------------------------------------------
def _make_fused_kernel(shapes, inv_batch, eps, final_dtype):
    num_layers = len(shapes)

    def kernel(*refs):
        x_ref = refs[0]
        o_ref = refs[1 + 4 * num_layers]
        wbufs = (refs[2 + 4 * num_layers], refs[3 + 4 * num_layers])
        sem = refs[4 + 4 * num_layers]

        copies = [None] * num_layers

        def start_fetch(i):                          # prefetch layer i's weight into slot i%2
            din, dout = shapes[i]
            slot = i % 2
            cp = pltpu.make_async_copy(refs[1 + 4 * i],            # weight i (stays in HBM)
                                       wbufs[slot].at[:din, :dout],
                                       sem.at[slot])
            cp.start()
            copies[i] = cp

        start_fetch(0)                               # prime layer 0
        h = x_ref[...]                               # (B, D0_pad) f32
        for i in range(num_layers):
            if i + 1 < num_layers:
                start_fetch(i + 1)                   # overlap next weight DMA with compute
            copies[i].wait()
            din, dout = shapes[i]
            wt = wbufs[i % 2][:din, :dout]
            out_dtype = jnp.bfloat16 if i + 1 < num_layers else final_dtype
            h = _layer_body(h, wt,
                            refs[2 + 4 * i][...],    # bias
                            refs[3 + 4 * i][...],    # gamma
                            refs[4 + 4 * i][...],    # beta
                            inv_batch, eps, out_dtype)
        o_ref[...] = h                               # single lane-dense store
    return kernel


def _mlp_fused(x_pad, padded_layers, batch, vmem_limit, eps=_EPS):
    num_layers = len(padded_layers)
    shapes = [wt.shape for (wt, _, _, _) in padded_layers]
    max_din = max(s[0] for s in shapes)
    max_dout = max(s[1] for s in shapes)
    dout_last = shapes[-1][1]

    vmem = pl.BlockSpec(memory_space=pltpu.MemorySpace.VMEM)
    flat_inputs = [x_pad]
    in_specs = [vmem]
    for (wt, bp, gp, btp) in padded_layers:
        flat_inputs += [wt, bp, gp, btp]
        in_specs += [pl.BlockSpec(memory_space=pl.ANY),   # weight: stream from HBM
                     vmem, vmem, vmem]                    # bias/gamma/beta: tiny, resident

    flops = sum(2 * batch * din * dout for (din, dout) in shapes)
    transcendentals = sum(dout for (_, dout) in shapes)   # one rsqrt per feature
    bytes_accessed = (sum(int(a.size) * a.dtype.itemsize for a in flat_inputs)
                      + batch * dout_last * 4)

    return pl.pallas_call(
        _make_fused_kernel(shapes, 1.0 / batch, eps, jnp.float32),
        out_shape=jax.ShapeDtypeStruct((batch, dout_last), jnp.float32),
        in_specs=in_specs,
        out_specs=vmem,
        scratch_shapes=[
            pltpu.VMEM((max_din, max_dout), jnp.bfloat16),   # weight slot 0
            pltpu.VMEM((max_din, max_dout), jnp.bfloat16),   # weight slot 1
            pltpu.SemaphoreType.DMA((2,)),
        ],
        compiler_params=pltpu.CompilerParams(vmem_limit_bytes=vmem_limit),
        cost_estimate=pl.CostEstimate(flops=int(flops),
                                      transcendentals=int(transcendentals),
                                      bytes_accessed=int(bytes_accessed)),
    )(*flat_inputs)


# ---------------------------------------------------------------------------
# Fallback: one FCLayer with a grid over the output-feature axis ("parallel",
# which also shards across the two TensorCores on v7x). BN stats are per-feature
# over the full batch, so feature tiles are independent.
# ---------------------------------------------------------------------------
def _fc_layer_tiled_kernel(x_ref, wt_ref, b_ref, g_ref, bt_ref, o_ref, *, inv_batch, eps):
    o_ref[...] = _layer_body(x_ref[...], wt_ref[...], b_ref[...], g_ref[...], bt_ref[...],
                             inv_batch, eps, o_ref.dtype)


def _pick_tn(batch, din_p, dout_p, in_item, out_item, vmem_budget):
    """Largest feature-tile (multiple of 128) whose working set fits the VMEM budget."""
    best, tn = 128, 128
    while tn <= dout_p:
        if dout_p % tn == 0:
            need = (batch * din_p * in_item          # resident x (constant index_map)
                    + 2 * din_p * tn * 2             # double-buffered bf16 weight tile
                    + 2 * batch * tn * out_item      # double-buffered output tile
                    + 2 * 3 * tn * 4)                # bias / gamma / beta tiles
            if need <= vmem_budget:
                best = tn
        tn *= 2
    return best


def _fc_layer_tiled(x, wt, b, gamma, beta, batch, out_dtype, vmem_limit, eps=_EPS):
    din_p, dout_p = wt.shape
    in_item = x.dtype.itemsize
    out_item = 2 if out_dtype == jnp.bfloat16 else 4
    tn = _pick_tn(batch, din_p, dout_p, in_item, out_item, vmem_limit - 4 * _MIB)
    grid = (dout_p // tn,)

    flops = 2 * batch * din_p * dout_p
    bytes_accessed = (batch * din_p * in_item        # x fetched once (constant index_map)
                      + din_p * dout_p * 2           # weights (bf16)
                      + 3 * dout_p * 4               # bias / gamma / beta
                      + batch * dout_p * out_item)   # output writeback

    # TODO(synk): for batch*din_p working sets beyond VMEM, add a batch grid axis with
    #             accumulated per-feature BN sums + a normalize pass; not needed here.
    return pl.pallas_call(
        partial(_fc_layer_tiled_kernel, inv_batch=1.0 / batch, eps=eps),
        out_shape=jax.ShapeDtypeStruct((batch, dout_p), out_dtype),
        grid_spec=pltpu.PrefetchScalarGridSpec(
            num_scalar_prefetch=0,
            grid=grid,
            in_specs=[
                pl.BlockSpec((batch, din_p), lambda j: (0, 0)),   # full batch, full K
                pl.BlockSpec((din_p, tn), lambda j: (0, j)),      # weight tile (K, TN)
                pl.BlockSpec((1, tn), lambda j: (0, j)),
                pl.BlockSpec((1, tn), lambda j: (0, j)),
                pl.BlockSpec((1, tn), lambda j: (0, j)),
            ],
            out_specs=pl.BlockSpec((batch, tn), lambda j: (0, j)),
        ),
        compiler_params=pltpu.CompilerParams(
            dimension_semantics=("parallel",),
            vmem_limit_bytes=vmem_limit),
        cost_estimate=pl.CostEstimate(flops=int(flops),
                                      transcendentals=int(dout_p),
                                      bytes_accessed=int(bytes_accessed)),
    )(x, wt, b, gamma, beta)


# ---------------------------------------------------------------------------
# Parameter handling / forward
# ---------------------------------------------------------------------------
def init_mlp_params(key, dim_in, dim_hidden, dim_out, num_layers):
    """Deterministic init matching MLP.__init__ / FCLayer._reset_parameters:
       weight ~ N(0, 1), bias = 0, BN gamma = 1, BN beta = 0."""
    if num_layers <= 1:
        layer_dims = [(dim_in, dim_out)]
    else:
        layer_dims = [(dim_in, dim_hidden)]
        layer_dims += [(dim_hidden, dim_hidden)] * (num_layers - 2)
        layer_dims += [(dim_hidden, dim_out)]

    params = []
    for (d_in, d_out) in layer_dims:
        key, wkey = jax.random.split(key)
        w = jax.random.normal(wkey, (d_out, d_in), dtype=jnp.float32)   # normal_(weight)
        b = jnp.zeros((d_out,), dtype=jnp.float32)                      # bias.zero_()
        gamma = jnp.ones((d_out,), dtype=jnp.float32)                   # BatchNorm1d weight
        beta = jnp.zeros((d_out,), dtype=jnp.float32)                   # BatchNorm1d bias
        params.append((w, b, gamma, beta))
    return params


def _pad_layer_params(w, b, gamma, beta, din_p, dout_p):
    """Pre-transpose W to (dim_in, dim_out), zero-pad to lane-aligned dims, cast W to bf16."""
    dout, din = w.shape
    wt = jnp.zeros((din_p, dout_p), jnp.float32).at[:din, :dout].set(w.T).astype(jnp.bfloat16)
    bp = jnp.zeros((1, dout_p), jnp.float32).at[:, :dout].set(b)
    gp = jnp.zeros((1, dout_p), jnp.float32).at[:, :dout].set(gamma)   # padded gamma = 0
    btp = jnp.zeros((1, dout_p), jnp.float32).at[:, :dout].set(beta)   # padded beta = 0
    return wt, bp, gp, btp


def _fused_vmem_bytes(batch, pdims):
    """Peak VMEM of the streamed fused kernel (weights double-buffered, not all resident)."""
    max_din = max(pdims[:-1])
    max_dout = max(pdims[1:])
    maxd = max(pdims)
    return (batch * pdims[0] * 4            # resident input x
            + batch * pdims[-1] * 4         # resident output
            + 2 * max_din * max_dout * 2    # streamed-weight double buffer (bf16)
            + 3 * sum(pdims[1:]) * 4        # bias / gamma / beta (resident)
            + 3 * batch * maxd * 4)         # live activation + BN temporaries


def mlp_forward(params, x, *, force_tiled=False):
    """MLP.forward: flatten to (batch, -1), then apply the FCLayer stack."""
    batch = x.shape[0]
    x = x.reshape(batch, -1).astype(jnp.float32)

    dims = [x.shape[1]] + [w.shape[0] for (w, _, _, _) in params]
    pdims = [_round_up(d, 128) for d in dims]

    x_pad = jnp.zeros((batch, pdims[0]), jnp.float32).at[:, :dims[0]].set(x)
    padded_layers = [
        _pad_layer_params(w, b, g, bt, pdims[i], pdims[i + 1])
        for i, (w, b, g, bt) in enumerate(params)
    ]

    vmem_cap = _tpu_vmem_capacity_bytes()
    vmem_limit = (vmem_cap * 3) // 4        # ~96 MiB on v5e/v6e, ~48 MiB on v7x
    fused_budget = vmem_cap // 2            # ~64 MiB on v5e/v6e, ~32 MiB on v7x

    use_tiled = force_tiled or _fused_vmem_bytes(batch, pdims) > fused_budget
    if not use_tiled and vmem_cap <= 64 * _MIB and batch >= 256:
        # v7x (2 TensorCores, 64 MiB VMEM): for compute-bound shapes prefer the
        # feature-tiled path whose "parallel" grid axis shards across both cores.
        use_tiled = True

    if use_tiled:
        h = x_pad
        n = len(padded_layers)
        for i, (wt, bp, gp, btp) in enumerate(padded_layers):
            out_dtype = jnp.bfloat16 if i + 1 < n else jnp.float32   # bf16 inter-layer acts
            h = _fc_layer_tiled(h, wt, bp, gp, btp, batch, out_dtype, vmem_limit)
        out_pad = h
    else:
        out_pad = _mlp_fused(x_pad, padded_layers, batch, vmem_limit)

    return out_pad[:, :dims[-1]]


def mlp_reference(params, x, eps=_EPS):
    """Pure-JAX reference with the same bf16 matmul inputs / bf16 inter-layer activations."""
    batch = x.shape[0]
    h = x.reshape(batch, -1).astype(jnp.float32)
    n = len(params)
    for i, (w, b, gamma, beta) in enumerate(params):
        y = jnp.dot(h.astype(jnp.bfloat16), w.T.astype(jnp.bfloat16),
                    preferred_element_type=jnp.float32) + b
        y = jnp.maximum(y, 0.0)
        mean = jnp.mean(y, axis=0, keepdims=True)
        var = jnp.mean((y - mean) ** 2, axis=0, keepdims=True)
        h = (y - mean) * jax.lax.rsqrt(var + eps) * gamma + beta
        if i + 1 < n:
            h = h.astype(jnp.bfloat16).astype(jnp.float32)
    return h


if __name__ == "__main__":
    key = jax.random.PRNGKey(0)
    key, xkey, pkey = jax.random.split(key, 3)

    # Small shapes: x of shape (batch=8, 4, 8) -> flattened dim_in = 32.
    # dim_hidden=160 pads to 256 while dim_in/dim_out pad to 128, so the streamed
    # weight double-buffer exercises differently-sized (sub-view) layer DMAs.
    batch, dim_in, dim_hidden, dim_out, num_layers = 8, 32, 160, 16, 3
    x = jax.random.normal(xkey, (batch, 4, 8), dtype=jnp.float32)

    params = init_mlp_params(pkey, dim_in, dim_hidden, dim_out, num_layers)

    # Fused streamed whole-stack kernel (default path for these shapes).
    out_fused = jax.block_until_ready(mlp_forward(params, x))
    assert out_fused.shape == (batch, dim_out), out_fused.shape

    # Exercise the per-layer feature-tiled fallback path as well.
    out_tiled = jax.block_until_ready(mlp_forward(params, x, force_tiled=True))
    assert out_tiled.shape == (batch, dim_out), out_tiled.shape

    ref = jax.block_until_ready(mlp_reference(params, x))
    assert bool(jnp.all(jnp.isfinite(out_fused))) and bool(jnp.all(jnp.isfinite(out_tiled)))
    assert bool(jnp.allclose(out_fused, ref, atol=5e-2, rtol=5e-2)), "fused kernel mismatch"
    assert bool(jnp.allclose(out_tiled, ref, atol=5e-2, rtol=5e-2)), "tiled kernel mismatch"

    print("KERNEL_OK")
</pallas_src>

<mosaic_0001>
module attributes {stable_mosaic.version = 11 : i64} {
  func.func @kernel(%arg0: memref<8x128xf32, #tpu.memory_space<vmem>>, %arg1: memref<128x256xbf16, #tpu.memory_space<any>>, %arg2: memref<1x256xf32, #tpu.memory_space<vmem>>, %arg3: memref<1x256xf32, #tpu.memory_space<vmem>>, %arg4: memref<1x256xf32, #tpu.memory_space<vmem>>, %arg5: memref<256x256xbf16, #tpu.memory_space<any>>, %arg6: memref<1x256xf32, #tpu.memory_space<vmem>>, %arg7: memref<1x256xf32, #tpu.memory_space<vmem>>, %arg8: memref<1x256xf32, #tpu.memory_space<vmem>>, %arg9: memref<256x128xbf16, #tpu.memory_space<any>>, %arg10: memref<1x128xf32, #tpu.memory_space<vmem>>, %arg11: memref<1x128xf32, #tpu.memory_space<vmem>>, %arg12: memref<1x128xf32, #tpu.memory_space<vmem>>, %arg13: memref<8x128xf32, #tpu.memory_space<vmem>>, %arg14: memref<256x256xbf16, #tpu.memory_space<vmem>>, %arg15: memref<256x256xbf16, #tpu.memory_space<vmem>>, %arg16: memref<2x!tpu.dma_semaphore, #tpu.memory_space<semaphore_mem>>) attributes {dimension_semantics = [], scalar_prefetch = 0 : i64, scratch_operands = 3 : i64, tpu.core_type = #tpu.core_type<tc>} {
    %c0_i32 = arith.constant 0 : i32
    %c0_i32_0 = arith.constant 0 : i32
    %c0_i32_1 = arith.constant 0 : i32
    %0 = tpu.memref_slice %arg14[%c0_i32_0, %c0_i32_1] : memref<256x256xbf16, #tpu.memory_space<vmem>> -> memref<128x256xbf16, #tpu.memory_space<vmem>>
    %1 = tpu.memref_slice %arg16[%c0_i32] : memref<2x!tpu.dma_semaphore, #tpu.memory_space<semaphore_mem>> -> memref<1x!tpu.dma_semaphore, #tpu.memory_space<semaphore_mem>>
    %2 = tpu.memref_squeeze %1 : memref<1x!tpu.dma_semaphore, #tpu.memory_space<semaphore_mem>> -> memref<!tpu.dma_semaphore, #tpu.memory_space<semaphore_mem>>
    tpu.enqueue_dma source(%arg1 : memref<128x256xbf16, #tpu.memory_space<any>>) target(%0 : memref<128x256xbf16, #tpu.memory_space<vmem>>) target_semaphore(%2 : memref<!tpu.dma_semaphore, #tpu.memory_space<semaphore_mem>>)
    %c0 = arith.constant 0 : index
    %c0_2 = arith.constant 0 : index
    %3 = vector.load %arg0[%c0, %c0_2] : memref<8x128xf32, #tpu.memory_space<vmem>>, vector<8x128xf32>
    %c1_i32 = arith.constant 1 : i32
    %c0_i32_3 = arith.constant 0 : i32
    %c0_i32_4 = arith.constant 0 : i32
    %4 = tpu.memref_slice %arg15[%c0_i32_3, %c0_i32_4] : memref<256x256xbf16, #tpu.memory_space<vmem>> -> memref<256x256xbf16, #tpu.memory_space<vmem>>
    %5 = tpu.memref_slice %arg16[%c1_i32] : memref<2x!tpu.dma_semaphore, #tpu.memory_space<semaphore_mem>> -> memref<1x!tpu.dma_semaphore, #tpu.memory_space<semaphore_mem>>
    %6 = tpu.memref_squeeze %5 : memref<1x!tpu.dma_semaphore, #tpu.memory_space<semaphore_mem>> -> memref<!tpu.dma_semaphore, #tpu.memory_space<semaphore_mem>>
    tpu.enqueue_dma source(%arg5 : memref<256x256xbf16, #tpu.memory_space<any>>) target(%4 : memref<256x256xbf16, #tpu.memory_space<vmem>>) target_semaphore(%6 : memref<!tpu.dma_semaphore, #tpu.memory_space<semaphore_mem>>)
    %c0_i32_5 = arith.constant 0 : i32
    %c0_i32_6 = arith.constant 0 : i32
    %c0_i32_7 = arith.constant 0 : i32
    %7 = tpu.memref_slice %arg14[%c0_i32_6, %c0_i32_7] : memref<256x256xbf16, #tpu.memory_space<vmem>> -> memref<128x256xbf16, #tpu.memory_space<vmem>>
    %8 = tpu.memref_slice %arg16[%c0_i32_5] : memref<2x!tpu.dma_semaphore, #tpu.memory_space<semaphore_mem>> -> memref<1x!tpu.dma_semaphore, #tpu.memory_space<semaphore_mem>>
    %9 = tpu.memref_squeeze %8 : memref<1x!tpu.dma_semaphore, #tpu.memory_space<semaphore_mem>> -> memref<!tpu.dma_semaphore, #tpu.memory_space<semaphore_mem>>
    tpu.wait_dma2 semaphore(%9 : memref<!tpu.dma_semaphore, #tpu.memory_space<semaphore_mem>>) src(%arg1 : memref<128x256xbf16, #tpu.memory_space<any>>) dst(%7 : memref<128x256xbf16, #tpu.memory_space<vmem>>)
    %c0_8 = arith.constant 0 : index
    %c0_9 = arith.constant 0 : index
    %10 = vector.load %arg14[%c0_8, %c0_9] : memref<256x256xbf16, #tpu.memory_space<vmem>>, vector<128x256xbf16>
    %c0_10 = arith.constant 0 : index
    %c0_11 = arith.constant 0 : index
    %11 = vector.load %arg2[%c0_10, %c0_11] : memref<1x256xf32, #tpu.memory_space<vmem>>, vector<1x256xf32>
    %c0_12 = arith.constant 0 : index
    %c0_13 = arith.constant 0 : index
    %12 = vector.load %arg3[%c0_12, %c0_13] : memref<1x256xf32, #tpu.memory_space<vmem>>, vector<1x256xf32>
    %c0_14 = arith.constant 0 : index
    %c0_15 = arith.constant 0 : index
    %13 = vector.load %arg4[%c0_14, %c0_15] : memref<1x256xf32, #tpu.memory_space<vmem>>, vector<1x256xf32>
    %14 = arith.truncf %3 : vector<8x128xf32> to vector<8x128xbf16>
    %cst = arith.constant dense<0.000000e+00> : vector<8x256xf32>
    %15 = tpu.matmul %14, %10, %cst {dimension_numbers = #tpu.dot_dimension_numbers<[1], [0], [0], [1], [0, 0, 1, 1], [], []>} : vector<8x128xbf16>, vector<128x256xbf16>, vector<8x256xf32> -> vector<8x256xf32>
    %16 = vector.broadcast %11 : vector<1x256xf32> to vector<8x256xf32>
    %17 = arith.addf %15, %16 : vector<8x256xf32>
    %cst_16 = arith.constant 0.000000e+00 : f32
    %18 = vector.broadcast %cst_16 : f32 to vector<8x256xf32>
    %19 = arith.maximumf %17, %18 : vector<8x256xf32>
    %cst_17 = arith.constant dense<0.000000e+00> : vector<256xf32>
    %20 = vector.multi_reduction <add>, %19, %cst_17 [0] : vector<8x256xf32> to vector<256xf32>
    %21 = vector.shape_cast %20 : vector<256xf32> to vector<1x256xf32>
    %cst_18 = arith.constant 1.250000e-01 : f32
    %22 = vector.broadcast %cst_18 : f32 to vector<1x256xf32>
    %23 = arith.mulf %21, %22 : vector<1x256xf32>
    %24 = vector.broadcast %23 : vector<1x256xf32> to vector<8x256xf32>
    %25 = arith.subf %19, %24 : vector<8x256xf32>
    %26 = arith.mulf %25, %25 : vector<8x256xf32>
    %cst_19 = arith.constant dense<0.000000e+00> : vector<256xf32>
    %27 = vector.multi_reduction <add>, %26, %cst_19 [0] : vector<8x256xf32> to vector<256xf32>
    %28 = vector.shape_cast %27 : vector<256xf32> to vector<1x256xf32>
    %cst_20 = arith.constant 1.250000e-01 : f32
    %29 = vector.broadcast %cst_20 : f32 to vector<1x256xf32>
    %30 = arith.mulf %28, %29 : vector<1x256xf32>
    %cst_21 = arith.constant 9.99999974E-6 : f32
    %31 = vector.broadcast %cst_21 : f32 to vector<1x256xf32>
    %32 = arith.addf %30, %31 : vector<1x256xf32>
    %33 = math.rsqrt %32 : vector<1x256xf32>
    %34 = vector.broadcast %33 : vector<1x256xf32> to vector<8x256xf32>
    %35 = arith.mulf %25, %34 : vector<8x256xf32>
    %36 = vector.broadcast %12 : vector<1x256xf32> to vector<8x256xf32>
    %37 = arith.mulf %35, %36 : vector<8x256xf32>
    %38 = vector.broadcast %13 : vector<1x256xf32> to vector<8x256xf32>
    %39 = arith.addf %37, %38 : vector<8x256xf32>
    %40 = arith.truncf %39 : vector<8x256xf32> to vector<8x256xbf16>
    %c0_i32_22 = arith.constant 0 : i32
    %c0_i32_23 = arith.constant 0 : i32
    %c0_i32_24 = arith.constant 0 : i32
    %41 = tpu.memref_slice %arg14[%c0_i32_23, %c0_i32_24] : memref<256x256xbf16, #tpu.memory_space<vmem>> -> memref<256x128xbf16, #tpu.memory_space<vmem>>
    %42 = tpu.memref_slice %arg16[%c0_i32_22] : memref<2x!tpu.dma_semaphore, #tpu.memory_space<semaphore_mem>> -> memref<1x!tpu.dma_semaphore, #tpu.memory_space<semaphore_mem>>
    %43 = tpu.memref_squeeze %42 : memref<1x!tpu.dma_semaphore, #tpu.memory_space<semaphore_mem>> -> memref<!tpu.dma_semaphore, #tpu.memory_space<semaphore_mem>>
    tpu.enqueue_dma source(%arg9 : memref<256x128xbf16, #tpu.memory_space<any>>) target(%41 : memref<256x128xbf16, #tpu.memory_space<vmem>>) target_semaphore(%43 : memref<!tpu.dma_semaphore, #tpu.memory_space<semaphore_mem>>)
    %c1_i32_25 = arith.constant 1 : i32
    %c0_i32_26 = arith.constant 0 : i32
    %c0_i32_27 = arith.constant 0 : i32
    %44 = tpu.memref_slice %arg15[%c0_i32_26, %c0_i32_27] : memref<256x256xbf16, #tpu.memory_space<vmem>> -> memref<256x256xbf16, #tpu.memory_space<vmem>>
    %45 = tpu.memref_slice %arg16[%c1_i32_25] : memref<2x!tpu.dma_semaphore, #tpu.memory_space<semaphore_mem>> -> memref<1x!tpu.dma_semaphore, #tpu.memory_space<semaphore_mem>>
    %46 = tpu.memref_squeeze %45 : memref<1x!tpu.dma_semaphore, #tpu.memory_space<semaphore_mem>> -> memref<!tpu.dma_semaphore, #tpu.memory_space<semaphore_mem>>
    tpu.wait_dma2 semaphore(%46 : memref<!tpu.dma_semaphore, #tpu.memory_space<semaphore_mem>>) src(%arg5 : memref<256x256xbf16, #tpu.memory_space<any>>) dst(%44 : memref<256x256xbf16, #tpu.memory_space<vmem>>)
    %c0_28 = arith.constant 0 : index
    %c0_29 = arith.constant 0 : index
    %47 = vector.load %arg15[%c0_28, %c0_29] : memref<256x256xbf16, #tpu.memory_space<vmem>>, vector<256x256xbf16>
    %c0_30 = arith.constant 0 : index
    %c0_31 = arith.constant 0 : index
    %48 = vector.load %arg6[%c0_30, %c0_31] : memref<1x256xf32, #tpu.memory_space<vmem>>, vector<1x256xf32>
    %c0_32 = arith.constant 0 : index
    %c0_33 = arith.constant 0 : index
    %49 = vector.load %arg7[%c0_32, %c0_33] : memref<1x256xf32, #tpu.memory_space<vmem>>, vector<1x256xf32>
    %c0_34 = arith.constant 0 : index
    %c0_35 = arith.constant 0 : index
    %50 = vector.load %arg8[%c0_34, %c0_35] : memref<1x256xf32, #tpu.memory_space<vmem>>, vector<1x256xf32>
    %cst_36 = arith.constant dense<0.000000e+00> : vector<8x256xf32>
    %51 = tpu.matmul %40, %47, %cst_36 {dimension_numbers = #tpu.dot_dimension_numbers<[1], [0], [0], [1], [0, 0, 1, 1], [], []>} : vector<8x256xbf16>, vector<256x256xbf16>, vector<8x256xf32> -> vector<8x256xf32>
    %52 = vector.broadcast %48 : vector<1x256xf32> to vector<8x256xf32>
    %53 = arith.addf %51, %52 : vector<8x256xf32>
    %cst_37 = arith.constant 0.000000e+00 : f32
    %54 = vector.broadcast %cst_37 : f32 to vector<8x256xf32>
    %55 = arith.maximumf %53, %54 : vector<8x256xf32>
    %cst_38 = arith.constant dense<0.000000e+00> : vector<256xf32>
    %56 = vector.multi_reduction <add>, %55, %cst_38 [0] : vector<8x256xf32> to vector<256xf32>
    %57 = vector.shape_cast %56 : vector<256xf32> to vector<1x256xf32>
    %cst_39 = arith.constant 1.250000e-01 : f32
    %58 = vector.broadcast %cst_39 : f32 to vector<1x256xf32>
    %59 = arith.mulf %57, %58 : vector<1x256xf32>
    %60 = vector.broadcast %59 : vector<1x256xf32> to vector<8x256xf32>
    %61 = arith.subf %55, %60 : vector<8x256xf32>
    %62 = arith.mulf %61, %61 : vector<8x256xf32>
    %cst_40 = arith.constant dense<0.000000e+00> : vector<256xf32>
    %63 = vector.multi_reduction <add>, %62, %cst_40 [0] : vector<8x256xf32> to vector<256xf32>
    %64 = vector.shape_cast %63 : vector<256xf32> to vector<1x256xf32>
    %cst_41 = arith.constant 1.250000e-01 : f32
    %65 = vector.broadcast %cst_41 : f32 to vector<1x256xf32>
    %66 = arith.mulf %64, %65 : vector<1x256xf32>
    %cst_42 = arith.constant 9.99999974E-6 : f32
    %67 = vector.broadcast %cst_42 : f32 to vector<1x256xf32>
    %68 = arith.addf %66, %67 : vector<1x256xf32>
    %69 = math.rsqrt %68 : vector<1x256xf32>
    %70 = vector.broadcast %69 : vector<1x256xf32> to vector<8x256xf32>
    %71 = arith.mulf %61, %70 : vector<8x256xf32>
    %72 = vector.broadcast %49 : vector<1x256xf32> to vector<8x256xf32>
    %73 = arith.mulf %71, %72 : vector<8x256xf32>
    %74 = vector.broadcast %50 : vector<1x256xf32> to vector<8x256xf32>
    %75 = arith.addf %73, %74 : vector<8x256xf32>
    %76 = arith.truncf %75 : vector<8x256xf32> to vector<8x256xbf16>
    %c0_i32_43 = arith.constant 0 : i32
    %c0_i32_44 = arith.constant 0 : i32
    %c0_i32_45 = arith.constant 0 : i32
    %77 = tpu.memref_slice %arg14[%c0_i32_44, %c0_i32_45] : memref<256x256xbf16, #tpu.memory_space<vmem>> -> memref<256x128xbf16, #tpu.memory_space<vmem>>
    %78 = tpu.memref_slice %arg16[%c0_i32_43] : memref<2x!tpu.dma_semaphore, #tpu.memory_space<semaphore_mem>> -> memref<1x!tpu.dma_semaphore, #tpu.memory_space<semaphore_mem>>
    %79 = tpu.memref_squeeze %78 : memref<1x!tpu.dma_semaphore, #tpu.memory_space<semaphore_mem>> -> memref<!tpu.dma_semaphore, #tpu.memory_space<semaphore_mem>>
    tpu.wait_dma2 semaphore(%79 : memref<!tpu.dma_semaphore, #tpu.memory_space<semaphore_mem>>) src(%arg9 : memref<256x128xbf16, #tpu.memory_space<any>>) dst(%77 : memref<256x128xbf16, #tpu.memory_space<vmem>>)
    %c0_46 = arith.constant 0 : index
    %c0_47 = arith.constant 0 : index
    %80 = vector.load %arg14[%c0_46, %c0_47] : memref<256x256xbf16, #tpu.memory_space<vmem>>, vector<256x128xbf16>
    %c0_48 = arith.constant 0 : index
    %c0_49 = arith.constant 0 : index
    %81 = vector.load %arg10[%c0_48, %c0_49] : memref<1x128xf32, #tpu.memory_space<vmem>>, vector<1x128xf32>
    %c0_50 = arith.constant 0 : index
    %c0_51 = arith.constant 0 : index
    %82 = vector.load %arg11[%c0_50, %c0_51] : memref<1x128xf32, #tpu.memory_space<vmem>>, vector<1x128xf32>
    %c0_52 = arith.constant 0 : index
    %c0_53 = arith.constant 0 : index
    %83 = vector.load %arg12[%c0_52, %c0_53] : memref<1x128xf32, #tpu.memory_space<vmem>>, vector<1x128xf32>
    %cst_54 = arith.constant dense<0.000000e+00> : vector<8x128xf32>
    %84 = tpu.matmul %76, %80, %cst_54 {dimension_numbers = #tpu.dot_dimension_numbers<[1], [0], [0], [1], [0, 0, 1, 1], [], []>} : vector<8x256xbf16>, vector<256x128xbf16>, vector<8x128xf32> -> vector<8x128xf32>
    %85 = vector.broadcast %81 : vector<1x128xf32> to vector<8x128xf32>
    %86 = arith.addf %84, %85 : vector<8x128xf32>
    %cst_55 = arith.constant 0.000000e+00 : f32
    %87 = vector.broadcast %cst_55 : f32 to vector<8x128xf32>
    %88 = arith.maximumf %86, %87 : vector<8x128xf32>
    %cst_56 = arith.constant dense<0.000000e+00> : vector<128xf32>
    %89 = vector.multi_reduction <add>, %88, %cst_56 [0] : vector<8x128xf32> to vector<128xf32>
    %90 = vector.shape_cast %89 : vector<128xf32> to vector<1x128xf32>
    %cst_57 = arith.constant 1.250000e-01 : f32
    %91 = vector.broadcast %cst_57 : f32 to vector<1x128xf32>
    %92 = arith.mulf %90, %91 : vector<1x128xf32>
    %93 = vector.broadcast %92 : vector<1x128xf32> to vector<8x128xf32>
    %94 = arith.subf %88, %93 : vector<8x128xf32>
    %95 = arith.mulf %94, %94 : vector<8x128xf32>
    %cst_58 = arith.constant dense<0.000000e+00> : vector<128xf32>
    %96 = vector.multi_reduction <add>, %95, %cst_58 [0] : vector<8x128xf32> to vector<128xf32>
    %97 = vector.shape_cast %96 : vector<128xf32> to vector<1x128xf32>
    %cst_59 = arith.constant 1.250000e-01 : f32
    %98 = vector.broadcast %cst_59 : f32 to vector<1x128xf32>
    %99 = arith.mulf %97, %98 : vector<1x128xf32>
    %cst_60 = arith.constant 9.99999974E-6 : f32
    %100 = vector.broadcast %cst_60 : f32 to vector<1x128xf32>
    %101 = arith.addf %99, %100 : vector<1x128xf32>
    %102 = math.rsqrt %101 : vector<1x128xf32>
    %103 = vector.broadcast %102 : vector<1x128xf32> to vector<8x128xf32>
    %104 = arith.mulf %94, %103 : vector<8x128xf32>
    %105 = vector.broadcast %82 : vector<1x128xf32> to vector<8x128xf32>
    %106 = arith.mulf %104, %105 : vector<8x128xf32>
    %107 = vector.broadcast %83 : vector<1x128xf32> to vector<8x128xf32>
    %108 = arith.addf %106, %107 : vector<8x128xf32>
    %c0_61 = arith.constant 0 : index
    %c0_62 = arith.constant 0 : index
    %109 = vector.load %arg13[%c0_61, %c0_62] : memref<8x128xf32, #tpu.memory_space<vmem>>, vector<8x128xf32>
    tpu.vector_store %arg13[%c0_61, %c0_62], %108 {strides = array<i32>} : memref<8x128xf32, #tpu.memory_space<vmem>>, vector<8x128xf32>,
    return
  }
}

</mosaic_0001>

<bundles_post_ra>
// kernel: tpu_custom_call.1
= control target key start
LH: loop header
LB: loop body
LE: loop exit
PB: predicated region body
PF: predicated region fallthrough
CT: control target
= control target key end

     0   :  { %18 = vsyncpa [#allocation6], 0  ;;  %s890_s0 = inlined_call_operand.hbm [shape: f32[8,128], index: 0, kind: input, shape index: {}]   ;;  %s891_s1 = inlined_call_operand.hbm [shape: bf16[128,256], index: 1, kind: input, shape index: {}]   ;;  %s892_s2 = inlined_call_operand.vmem [shape: f32[1,256], index: 2, kind: input, shape index: {}]   ;;  %s893_s3 = inlined_call_operand.vmem [shape: f32[1,256], index: 3, kind: input, shape index: {}]   ;;  %s894_s4 = inlined_call_operand.vmem [shape: f32[1,256], index: 4, kind: input, shape index: {}]   ;;  %s895_s5 = inlined_call_operand.hbm [shape: bf16[256,256], index: 5, kind: input, shape index: {}]   ;;  %s896_s6 = inlined_call_operand.vmem [shape: f32[1,256], index: 6, kind: input, shape index: {}]   ;;  %s897_s7 = inlined_call_operand.vmem [shape: f32[1,256], index: 7, kind: input, shape index: {}]   ;;  %s898_s8 = inlined_call_operand.vmem [shape: f32[1,256], index: 8, kind: input, shape index: {}]   ;;  %s899_s9 = inlined_call_operand.hbm [shape: bf16[256,128], index: 9, kind: input, shape index: {}]   ;;  %s900_s10 = inlined_call_operand.vmem [shape: f32[1,128], index: 10, kind: input, shape index: {}]   ;;  %s901_s11 = inlined_call_operand.vmem [shape: f32[1,128], index: 11, kind: input, shape index: {}]   ;;  %s902_s12 = inlined_call_operand.vmem [shape: f32[1,128], index: 12, kind: input, shape index: {}]   ;;  %s903_s13 = inlined_call_operand.hbm [shape: f32[8,128], index: 13, kind: output, shape index: {}]  }
   0x1   :  { %19 = vsyncpa [#allocation7], 0  ;;  %s694_s25 = smov [#allocation5]   ;;  %s618_s29 = scalar_lea.hbm %s890_s0, 128 }
   0x2   :  { %s26_s26 = sshll.u32 %s694_s25, 4  ;;  %p619_p0 = scmp.ne.s32.totalorder %s890_s0, %s618_s29  ;;  %s27_s26 = int_to_ptr.vmem [resolvable:$true] %s26_s26 }
   0x3   :  { %p622_p1 = scmp.lt.u32.totalorder %s618_s29, %s890_s0 }
   0x5   :  { %p624_p2 = pnand %p622_p1, %p619_p0 }
   0x7   :  { %627 = shalt.err (!%p624_p2)
}
   0x8   :  { %s628_s17 = scalar_lea.vmem %s27_s26, 128  ;;  %p633_p4 = scmp.lt.s32.totalorder %s27_s26, %s27_s26 }
   0x9   :  { %p629_p3 = scmp.ne.s32.totalorder %s27_s26, %s628_s17  ;;  %p634_p5 = scmp.lt.s32.totalorder %s628_s17, %s628_s17 }
   0xb   :  { %p635_p6 = por %p634_p5, %p633_p4 }
   0xd   :  { %p636_p7 = pnand %p635_p6, %p629_p3 }
   0xf   :  { %639 = shalt.err (!%p636_p7)
}
  0x10   :  { %29 = dma.hbm_to_vmem [thread:$0]  %s890_s0, 128, %s27_s26, [#allocation6]  }
  0x11   :  { %684 = dma.done.wait [#allocation6], 128  }
  0x12   :  { %685 = vsyncadd [#allocation6], 4294967168  ;;  %s56_s20 = sld [smem:[#allocation0]]   ;;  %s695_s21 = smov 256  }
  0x13   :  { %68 = sst [smem:[#allocation10]] %s695_s21  ;;  %s696_s22 = smov 2  }
  0x14   :  { %70 = sst [smem:[#allocation10 + $0x1]] %s695_s21  ;;  %s697_s23 = smov 64  }
  0x15   :  { %72 = sst [smem:[#allocation10 + $0x2]] %s696_s22  ;;  %s698_s24 = smov 128  }
  0x16   :  { %74 = sst [smem:[#allocation10 + $0x3]] %s697_s23  ;;  %s699_s25 = smov [#allocation2]  }
  0x17   :  { %76 = sst [smem:[#allocation10 + $0x4]] %s698_s24  ;;  %s64_s27 = sshll.u32 %s699_s25, 4  ;;  %s795_s27 = int_to_ptr.vmem [resolvable:$true] %s64_s27 }
  0x18   :  { %78 = sst [smem:[#allocation10 + $0x5]] %s696_s22  ;;  %s562_s28 = sshll.u32 %s56_s20, 26 }
  0x19   :  { %80 = sst [smem:[#allocation10 + $0x6]] %s698_s24  ;;  %s563_s0 = sadd.s32 134217728, %s562_s28 }
  0x1a   :  { %82 = sst [smem:[#allocation10 + $0x7]] %s697_s23  ;;  %s700_s26 = smov 4  }
  0x1b   :  { %84 = sst [smem:[#allocation10 + $0x8]] %s700_s26  ;;  %s701_s29 = smov [#allocation4]  }
  0x1c   :  { %s702_s30 = smov [#allocation9]   ;;  %s703_s16 = smov [#allocation3]  }
  0x1d   :  { %86 = dma.general %s891_s1, 2048, %s795_s27, %s701_s29, %s702_s30, [#allocation10], %s563_s0, 0  }
  0x1e   :  { %104 = sst [smem:[#allocation12]] %s695_s21  ;;  %s100_s17 = sshll.u32 %s703_s16, 4  ;;  %v87_v0 = vld [vmem:[#allocation5] sm:$0xff]  ;;  %s101_s17 = int_to_ptr.vmem [resolvable:$true] %s100_s17 }
  0x1f   :  { %106 = sst [smem:[#allocation12 + $0x1]] %s695_s21  ;;  %s704_s18 = smov [#allocation4 + $0x1]  }
  0x20   :  { %108 = sst [smem:[#allocation12 + $0x2]] %s696_s22  ;;  %s705_s19 = smov [#allocation11]  }
  0x21   :  { %110 = sst [smem:[#allocation12 + $0x3]] %s697_s23 }
  0x22   :  { %112 = sst [smem:[#allocation12 + $0x4]] %s698_s24 }
  0x23   :  { %114 = sst [smem:[#allocation12 + $0x5]] %s696_s22 }
  0x24   :  { %116 = sst [smem:[#allocation12 + $0x6]] %s698_s24 }
  0x25   :  { %118 = sst [smem:[#allocation12 + $0x7]] %s697_s23 }
  0x26   :  { %120 = sst [smem:[#allocation12 + $0x8]] %s700_s26 }
  0x27   :  { %122 = dma.general %s895_s5, 4096, %s101_s17, %s704_s18, %s705_s19, [#allocation12], %s563_s0, 0  }
  0x28   :  { %686 = dma.done.wait [#allocation4], 2048 }
  0x29   :  { %687 = vsyncadd [#allocation4], 4294965248  ;;  %v706_v1 = vmov 0   ;;  %v128_v2 = vld [vmem:[#allocation2 + $0x8] sm:$0xff]  ;;  %v127_v3 = vld [vmem:[#allocation2] sm:$0xff]  ;;  %v146_v18 = vpack.c.bf16 %v87_v0, %v87_v0  ;;  %s640_s23 = scalar_lea.hbm %s899_s9, 2048 }
  0x2a   :  { %190 = vmatprep.mubr.bf16.mxu0 %v706_v1  ;;  %v130_v4 = vld [vmem:[#allocation2 + $0x18] sm:$0xff]  ;;  %158 = vmatprep.subr.bf16.mxu0 %v128_v2  ;;  %v129_v5 = vld [vmem:[#allocation2 + $0x10] sm:$0xff]  ;;  %v132_v6 = vld [vmem:[#allocation2 + $0x28] sm:$0xff]  ;;  %p641_p8 = scmp.ne.s32.totalorder %s899_s9, %s640_s23  ;;  %p644_p9 = scmp.lt.u32.totalorder %s640_s23, %s899_s9 }
  0x2b   :  { %159 = vmatpush1.bf16.msra.mxu0 %v127_v3  ;;  %v131_v7 = vld [vmem:[#allocation2 + $0x20] sm:$0xff]  ;;  %v134_v8 = vld [vmem:[#allocation2 + $0x38] sm:$0xff]  ;;  %v133_v9 = vld [vmem:[#allocation2 + $0x30] sm:$0xff] }
  0x2c   :  { %160 = vmatprep.subr.bf16.mxu0 %v130_v4  ;;  %v136_v10 = vld [vmem:[#allocation2 + $0x48] sm:$0xff]  ;;  %v135_v11 = vld [vmem:[#allocation2 + $0x40] sm:$0xff]  ;;  %v138_v12 = vld [vmem:[#allocation2 + $0x58] sm:$0xff]  ;;  %p646_p10 = pnand %p644_p9, %p641_p8 }
  0x2d   :  { %v137_v13 = vld [vmem:[#allocation2 + $0x50] sm:$0xff]  ;;  %v140_v14 = vld [vmem:[#allocation2 + $0x68] sm:$0xff]  ;;  %v139_v15 = vld [vmem:[#allocation2 + $0x60] sm:$0xff] }
  0x2e   :  { %v142_v16 = vld [vmem:[#allocation2 + $0x78] sm:$0xff]  ;;  %v141_v17 = vld [vmem:[#allocation2 + $0x70] sm:$0xff] }
  0x2f   :  { %161 = vmatpush1.bf16.msra.mxu0 %v129_v5 }
  0x30   :  { %162 = vmatprep.subr.bf16.mxu0 %v132_v6 }
  0x33   :  { %163 = vmatpush1.bf16.msra.mxu0 %v131_v7 }
  0x34   :  { %164 = vmatprep.subr.bf16.mxu0 %v134_v8 }
  0x37   :  { %165 = vmatpush1.bf16.msra.mxu0 %v133_v9 }
  0x38   :  { %166 = vmatprep.subr.bf16.mxu0 %v136_v10 }
  0x3b   :  { %167 = vmatpush1.bf16.msra.mxu0 %v135_v11 }
  0x3c   :  { %168 = vmatprep.subr.bf16.mxu0 %v138_v12 }
  0x3f   :  { %169 = vmatpush1.bf16.msra.mxu0 %v137_v13 }
  0x40   :  { %170 = vmatprep.subr.bf16.mxu0 %v140_v14 }
  0x43   :  { %171 = vmatpush1.bf16.msra.mxu0 %v139_v15 }
  0x44   :  { %172 = vmatprep.subr.bf16.mxu0 %v142_v16 }
  0x47   :  { %173 = vmatpush1.bf16.msra.mxu0 %v141_v17 }
  0x4a   :  { %191 = vmatmul.mubr.bf16.vlgmr.msra.gmra.mrb[0].mxu0 %v146_v18 }
  0x4b   :  { %649 = shalt.err (!%p646_p10)  }
  0x4c   :  { %s650_s29 = scalar_lea.vmem %s795_s27, 2048  ;;  %s654_s30 = scalar_lea.vmem %s795_s27, 4096 }
  0x4d   :  { %p651_p11 = scmp.ne.s32.totalorder %s795_s27, %s650_s29  ;;  %p655_p12 = scmp.lt.s32.totalorder %s795_s27, %s795_s27 }
  0x4e   :  { %p656_p13 = scmp.lt.s32.totalorder %s654_s30, %s650_s29 }
  0x50   :  { %p657_p0 = por %p656_p13, %p655_p12 }
  0x52   :  { %p658_p1 = pnand %p657_p0, %p651_p11 }
  0x54   :  { %661 = shalt.err (!%p658_p1)  }
  0x55   :  { %s707_s14 = smov 8   ;;  %v148_v19 = vlaneseq  ;;  %v143_v22 = vld [vmem:[%s892_s2] sm:$0x3] }
  0x56   :  { %271 = dma.hbm_to_vmem [thread:$0]  %s899_s9, 2048, %s795_s27, [#allocation4], %s698_s24, %s695_s21, %s707_s14 }
  0x57   :  { %v149_v20 = vshrl.u32 %v148_v19, 7  ;;  %v144_v4 = vld [vmem:[%s893_s3] sm:$0x3] }
  0x58   :  { %v145_v5 = vld [vmem:[%s894_s4] sm:$0x3] }
  0x59   :  { %v828_v21 = vsub.s32 0, %v149_v20  ;;  %v833_v23 = vsub.s32 1, %v149_v20 }
  0x5b   :  { %v151_v24 = vrot.slane %v143_v22, %v828_v21  ;;  %v155_v25 = vrot.slane %v143_v22, %v833_v23  ;;  %v243_v6 = vrot.slane %v144_v4, %v828_v21  ;;  %v247_v8 = vrot.slane %v144_v4, %v833_v23 }
  0x5c   :  { %v256_v11 = vrot.slane %v145_v5, %v828_v21  ;;  %v260_v13 = vrot.slane %v145_v5, %v833_v23 }
 0x11d   :  { %v192_v26 = vpop.f32.mrb[0].mxu0 }
 0x11e   :  { %v193_v27 = vadd.f32 %v192_v26, %v151_v24  ;;  %v194_v28 = vpop.f32.mrb[1].mxu0 }
 0x11f   :  { %v195_v29 = vadd.f32 %v194_v28, %v155_v25  ;;  %v196_v30 = vpop.f32.mrb[2].mxu0 }
 0x120   :  { %v199_v31 = vmax.f32 %v193_v27, 0.0  ;;  %v197_v32 = vpop.f32.mrb[3].mxu0 }
 0x121   :  { %v200_v33 = vmax.f32 %v195_v29, 0.0 }
 0x122   :  { %v201_v34 = vrot.slane %v199_v31, 4 }
 0x123   :  { %v207_v35 = vrot.slane %v200_v33, 4 }
 0x124   :  { %v202_v36 = vadd.f32 %v201_v34, %v199_v31 }
 0x125   :  { %v208_v37 = vadd.f32 %v207_v35, %v200_v33 }
 0x126   :  { %v203_v38 = vrot.slane %v202_v36, 2 }
 0x127   :  { %v209_v39 = vrot.slane %v208_v37, 2 }
 0x128   :  { %v204_v40 = vadd.f32 %v203_v38, %v202_v36 }
 0x129   :  { %v210_v41 = vadd.f32 %v209_v39, %v208_v37 }
 0x12a   :  { %v205_v42 = vrot.slane %v204_v40, 1 }
 0x12b   :  { %v211_v43 = vrot.slane %v210_v41, 1 }
 0x12c   :  { %v206_v44 = vadd.f32 %v205_v42, %v204_v40 }
 0x12d   :  { %v212_v45 = vadd.f32 %v211_v43, %v210_v41 }
 0x12e   :  { %v213_v46 = vmul.f32 0.125, %v206_v44 }
 0x12f   :  { %v214_v47 = vmul.f32 0.125, %v212_v45 }
 0x130   :  { %v215_v48 = vsub.f32 %v199_v31, %v213_v46 }
 0x131   :  { %v216_v49 = vsub.f32 %v200_v33, %v214_v47 }
 0x132   :  { %v217_v50 = vmul.f32 %v215_v48, %v215_v48 }
 0x133   :  { %v218_v51 = vmul.f32 %v216_v49, %v216_v49 }
 0x134   :  { %v219_v52 = vrot.slane %v217_v50, 4 }
 0x135   :  { %v225_v53 = vrot.slane %v218_v51, 4 }
 0x136   :  { %v220_v54 = vadd.f32 %v219_v52, %v217_v50 }
 0x137   :  { %v226_v55 = vadd.f32 %v225_v53, %v218_v51 }
 0x138   :  { %v221_v56 = vrot.slane %v220_v54, 2 }
 0x139   :  { %v227_v57 = vrot.slane %v226_v55, 2 }
 0x13a   :  { %v222_v58 = vadd.f32 %v221_v56, %v220_v54 }
 0x13b   :  { %v228_v59 = vadd.f32 %v227_v57, %v226_v55 }
 0x13c   :  { %v223_v60 = vrot.slane %v222_v58, 1 }
 0x13d   :  { %v229_v61 = vrot.slane %v228_v59, 1 }
 0x13e   :  { %v224_v62 = vadd.f32 %v223_v60, %v222_v58 }
 0x13f   :  { %v230_v63 = vadd.f32 %v229_v61, %v228_v59 }
 0x140   :  { %v231_v0 = vmul.f32 0.125, %v224_v62 }
 0x141   :  { %v232_v1 = vmul.f32 0.125, %v230_v63 }
 0x142   :  { %v233_v2 = vadd.f32 1e-05, %v231_v0 }
 0x143   :  { %v234_v3 = vadd.f32 1e-05, %v232_v1 }
 0x144   :  { %608 = vrsqrt.f32 %v233_v2 }
 0x145   :  { %610 = vrsqrt.f32 %v234_v3 }
 0x14e   :  { %v609_v7 = vpop.eup %608 }
 0x14f   :  { %v611_v9 = vpop.eup %610  ;;  %v237_v10 = vmul.f32 %v609_v7, %v215_v48 }
 0x150   :  { %v238_v12 = vmul.f32 %v611_v9, %v216_v49 }
 0x151   :  { %v250_v14 = vmul.f32 %v243_v6, %v237_v10 }
 0x152   :  { %v251_v15 = vmul.f32 %v247_v8, %v238_v12 }
 0x153   :  { %v847_v16 = vadd.f32 %v256_v11, %v250_v14 }
 0x154   :  { %v264_v17 = vadd.f32 %v260_v13, %v251_v15 }
 0x155   :  { %v265_v18 = vpack.c.bf16 %v847_v16, %v847_v16 }
 0x156   :  { %v266_v19 = vpack.c.bf16 %v264_v17, %v264_v17 }
 0x157   :  { %688 = dma.done.wait [#allocation4 + $0x1], 4096 }
 0x158   :  { %689 = vsyncadd [#allocation4 + $0x1], 4294963200  ;;  %354 = vmatprep.mubr.bf16.mxu1 %v266_v19  ;;  %v277_v20 = vld [vmem:[#allocation3 + $0x8] sm:$0xff]  ;;  %v276_v22 = vld [vmem:[#allocation3] sm:$0xff] }
 0x159   :  { %v279_v24 = vld [vmem:[#allocation3 + $0x18] sm:$0xff]  ;;  %322 = vmatprep.subr.bf16.mxu1 %v277_v20  ;;  %v278_v25 = vld [vmem:[#allocation3 + $0x10] sm:$0xff]  ;;  %v281_v26 = vld [vmem:[#allocation3 + $0x28] sm:$0xff] }
 0x15a   :  { %323 = vmatpush1.bf16.msra.mxu1 %v276_v22  ;;  %v280_v27 = vld [vmem:[#allocation3 + $0x20] sm:$0xff]  ;;  %v283_v28 = vld [vmem:[#allocation3 + $0x38] sm:$0xff]  ;;  %v282_v29 = vld [vmem:[#allocation3 + $0x30] sm:$0xff] }
 0x15b   :  { %324 = vmatprep.subr.bf16.mxu1 %v279_v24  ;;  %v285_v30 = vld [vmem:[#allocation3 + $0x48] sm:$0xff]  ;;  %v284_v31 = vld [vmem:[#allocation3 + $0x40] sm:$0xff]  ;;  %v287_v32 = vld [vmem:[#allocation3 + $0x58] sm:$0xff] }
 0x15c   :  { %v286_v33 = vld [vmem:[#allocation3 + $0x50] sm:$0xff]  ;;  %v289_v34 = vld [vmem:[#allocation3 + $0x68] sm:$0xff]  ;;  %v288_v35 = vld [vmem:[#allocation3 + $0x60] sm:$0xff] }
 0x15d   :  { %v291_v36 = vld [vmem:[#allocation3 + $0x78] sm:$0xff]  ;;  %v290_v37 = vld [vmem:[#allocation3 + $0x70] sm:$0xff]  ;;  %v293_v38 = vld [vmem:[#allocation3 + $0x88] sm:$0xff] }
 0x15e   :  { %325 = vmatpush1.bf16.msra.mxu1 %v278_v25  ;;  %v292_v39 = vld [vmem:[#allocation3 + $0x80] sm:$0xff]  ;;  %v295_v40 = vld [vmem:[#allocation3 + $0x98] sm:$0xff]  ;;  %v294_v41 = vld [vmem:[#allocation3 + $0x90] sm:$0xff] }
 0x15f   :  { %326 = vmatprep.subr.bf16.mxu1 %v281_v26  ;;  %v297_v42 = vld [vmem:[#allocation3 + $0xa8] sm:$0xff]  ;;  %v296_v43 = vld [vmem:[#allocation3 + $0xa0] sm:$0xff]  ;;  %v299_v44 = vld [vmem:[#allocation3 + $0xb8] sm:$0xff] }
 0x160   :  { %v298_v45 = vld [vmem:[#allocation3 + $0xb0] sm:$0xff]  ;;  %v301_v46 = vld [vmem:[#allocation3 + $0xc8] sm:$0xff]  ;;  %v300_v47 = vld [vmem:[#allocation3 + $0xc0] sm:$0xff] }
 0x161   :  { %v303_v48 = vld [vmem:[#allocation3 + $0xd8] sm:$0xff]  ;;  %v302_v49 = vld [vmem:[#allocation3 + $0xd0] sm:$0xff]  ;;  %v305_v50 = vld [vmem:[#allocation3 + $0xe8] sm:$0xff] }
 0x162   :  { %327 = vmatpush1.bf16.msra.mxu1 %v280_v27  ;;  %v304_v51 = vld [vmem:[#allocation3 + $0xe0] sm:$0xff]  ;;  %v307_v52 = vld [vmem:[#allocation3 + $0xf8] sm:$0xff]  ;;  %v306_v53 = vld [vmem:[#allocation3 + $0xf0] sm:$0xff] }
 0x163   :  { %328 = vmatprep.subr.bf16.mxu1 %v283_v28  ;;  %v308_v54 = vld [vmem:[%s896_s6] sm:$0x3] }
 0x164   :  { %v315_v55 = vrot.slane %v308_v54, %v828_v21  ;;  %v319_v56 = vrot.slane %v308_v54, %v833_v23 }
 0x166   :  { %329 = vmatpush1.bf16.msra.mxu1 %v282_v29 }
 0x167   :  { %330 = vmatprep.subr.bf16.mxu1 %v285_v30 }
 0x16a   :  { %331 = vmatpush1.bf16.msra.mxu1 %v284_v31 }
 0x16b   :  { %332 = vmatprep.subr.bf16.mxu1 %v287_v32 }
 0x16e   :  { %333 = vmatpush1.bf16.msra.mxu1 %v286_v33 }
 0x16f   :  { %334 = vmatprep.subr.bf16.mxu1 %v289_v34 }
 0x172   :  { %335 = vmatpush1.bf16.msra.mxu1 %v288_v35 }
 0x173   :  { %336 = vmatprep.subr.bf16.mxu1 %v291_v36 }
 0x176   :  { %337 = vmatpush1.bf16.msra.mxu1 %v290_v37  ;;  %v309_v37 = vld [vmem:[%s897_s7] sm:$0x3] }
 0x177   :  { %338 = vmatprep.subr.bf16.mxu1 %v293_v38  ;;  %v310_v38 = vld [vmem:[%s898_s8] sm:$0x3] }
 0x17a   :  { %339 = vmatpush1.bf16.msra.mxu1 %v292_v39  ;;  %v407_v39 = vrot.slane %v309_v37, %v828_v21 }
 0x17b   :  { %340 = vmatprep.subr.bf16.mxu1 %v295_v40 }
 0x17e   :  { %341 = vmatpush1.bf16.msra.mxu1 %v294_v41  ;;  %v411_v41 = vrot.slane %v309_v37, %v833_v23 }
 0x17f   :  { %342 = vmatprep.subr.bf16.mxu1 %v297_v42 }
 0x182   :  { %343 = vmatpush1.bf16.msra.mxu1 %v296_v43 }
 0x183   :  { %344 = vmatprep.subr.bf16.mxu1 %v299_v44  ;;  %v420_v44 = vrot.slane %v310_v38, %v828_v21 }
 0x186   :  { %345 = vmatpush1.bf16.msra.mxu1 %v298_v45 }
 0x187   :  { %346 = vmatprep.subr.bf16.mxu1 %v301_v46  ;;  %v424_v46 = vrot.slane %v310_v38, %v833_v23 }
 0x18a   :  { %347 = vmatpush1.bf16.msra.mxu1 %v300_v47 }
 0x18b   :  { %348 = vmatprep.subr.bf16.mxu1 %v303_v48 }
 0x18e   :  { %349 = vmatpush1.bf16.msra.mxu1 %v302_v49 }
 0x18f   :  { %350 = vmatprep.subr.bf16.mxu1 %v305_v50 }
 0x192   :  { %351 = vmatpush1.bf16.msra.mxu1 %v304_v51 }
 0x193   :  { %352 = vmatprep.subr.bf16.mxu1 %v307_v52 }
 0x196   :  { %353 = vmatpush1.bf16.msra.mxu1 %v306_v53 }
 0x199   :  { %355 = vmatmul.mubr.bf16.vlgmr.msra.gmra.mrb[0].mxu1 %v265_v18 }
 0x26c   :  { %v356_v57 = vpop.f32.mrb[0].mxu1 }
 0x26d   :  { %v357_v58 = vadd.f32 %v356_v57, %v315_v55  ;;  %v358_v59 = vpop.f32.mrb[1].mxu1 }
 0x26e   :  { %v359_v60 = vadd.f32 %v358_v59, %v319_v56  ;;  %v360_v61 = vpop.f32.mrb[2].mxu1 }
 0x26f   :  { %v363_v62 = vmax.f32 %v357_v58, 0.0  ;;  %v361_v63 = vpop.f32.mrb[3].mxu1 }
 0x270   :  { %v364_v0 = vmax.f32 %v359_v60, 0.0 }
 0x271   :  { %v365_v1 = vrot.slane %v363_v62, 4 }
 0x272   :  { %v371_v2 = vrot.slane %v364_v0, 4 }
 0x273   :  { %v366_v3 = vadd.f32 %v365_v1, %v363_v62 }
 0x274   :  { %v372_v4 = vadd.f32 %v371_v2, %v364_v0 }
 0x275   :  { %v367_v5 = vrot.slane %v366_v3, 2 }
 0x276   :  { %v373_v6 = vrot.slane %v372_v4, 2 }
 0x277   :  { %v368_v7 = vadd.f32 %v367_v5, %v366_v3 }
 0x278   :  { %v374_v8 = vadd.f32 %v373_v6, %v372_v4 }
 0x279   :  { %v369_v9 = vrot.slane %v368_v7, 1 }
 0x27a   :  { %v375_v10 = vrot.slane %v374_v8, 1 }
 0x27b   :  { %v370_v11 = vadd.f32 %v369_v9, %v368_v7 }
 0x27c   :  { %v376_v12 = vadd.f32 %v375_v10, %v374_v8 }
 0x27d   :  { %v377_v13 = vmul.f32 0.125, %v370_v11 }
 0x27e   :  { %v378_v14 = vmul.f32 0.125, %v376_v12 }
 0x27f   :  { %v379_v15 = vsub.f32 %v363_v62, %v377_v13 }
 0x280   :  { %v380_v16 = vsub.f32 %v364_v0, %v378_v14 }
 0x281   :  { %v381_v17 = vmul.f32 %v379_v15, %v379_v15 }
 0x282   :  { %v382_v18 = vmul.f32 %v380_v16, %v380_v16 }
 0x283   :  { %v383_v19 = vrot.slane %v381_v17, 4 }
 0x284   :  { %v389_v20 = vrot.slane %v382_v18, 4 }
 0x285   :  { %v384_v22 = vadd.f32 %v383_v19, %v381_v17 }
 0x286   :  { %v390_v24 = vadd.f32 %v389_v20, %v382_v18 }
 0x287   :  { %v385_v25 = vrot.slane %v384_v22, 2 }
 0x288   :  { %v391_v26 = vrot.slane %v390_v24, 2 }
 0x289   :  { %v386_v27 = vadd.f32 %v385_v25, %v384_v22 }
 0x28a   :  { %v392_v28 = vadd.f32 %v391_v26, %v390_v24 }
 0x28b   :  { %v387_v29 = vrot.slane %v386_v27, 1 }
 0x28c   :  { %v393_v30 = vrot.slane %v392_v28, 1 }
 0x28d   :  { %v388_v31 = vadd.f32 %v387_v29, %v386_v27 }
 0x28e   :  { %v394_v32 = vadd.f32 %v393_v30, %v392_v28 }
 0x28f   :  { %v395_v33 = vmul.f32 0.125, %v388_v31 }
 0x290   :  { %v396_v34 = vmul.f32 0.125, %v394_v32 }
 0x291   :  { %v397_v35 = vadd.f32 1e-05, %v395_v33 }
 0x292   :  { %v398_v36 = vadd.f32 1e-05, %v396_v34 }
 0x293   :  { %612 = vrsqrt.f32 %v397_v35 }
 0x294   :  { %614 = vrsqrt.f32 %v398_v36 }
 0x29d   :  { %v613_v40 = vpop.eup %612 }
 0x29e   :  { %v615_v42 = vpop.eup %614  ;;  %v401_v43 = vmul.f32 %v613_v40, %v379_v15 }
 0x29f   :  { %v402_v45 = vmul.f32 %v615_v42, %v380_v16 }
 0x2a0   :  { %v414_v47 = vmul.f32 %v407_v39, %v401_v43 }
 0x2a1   :  { %v415_v48 = vmul.f32 %v411_v41, %v402_v45 }
 0x2a2   :  { %v427_v49 = vadd.f32 %v420_v44, %v414_v47 }
 0x2a3   :  { %v428_v50 = vadd.f32 %v424_v46, %v415_v48 }
 0x2a4   :  { %v429_v51 = vpack.c.bf16 %v427_v49, %v427_v49 }
 0x2a5   :  { %v430_v52 = vpack.c.bf16 %v428_v50, %v428_v50 }
 0x2a6   :  { %690 = dma.done.wait [#allocation4], 2048 }
 0x2a7   :  { %691 = vsyncadd [#allocation4], 4294965248  ;;  %491 = vmatprep.mubr.bf16.mxu0 %v430_v52  ;;  %v442_v53 = vld [vmem:[#allocation2 + $0x80] sm:$0xff]  ;;  %v443_v55 = vld [vmem:[#allocation2 + $0x90] sm:$0xff]  ;;  %s708_s23 = smov [#allocation8]  }
 0x2a8   :  { %v434_v54 = vld [vmem:[#allocation2] sm:$0xff]  ;;  %571 = vmatprep.subr.bf16.mxu0 %v442_v53  ;;  %v435_v56 = vld [vmem:[#allocation2 + $0x10] sm:$0xff]  ;;  %s540_s25 = sshll.u32 %s708_s23, 4  ;;  %s541_s25 = int_to_ptr.vmem [resolvable:$true] %s540_s25 }
 0x2a9   :  { %572 = vmatpush3.bf16.msra.mxu0 %v434_v54  ;;  %v444_v21 = vld [vmem:[#allocation2 + $0xa0] sm:$0xff]  ;;  %v445_v57 = vld [vmem:[#allocation2 + $0xb0] sm:$0xff]  ;;  %s662_s28 = scalar_lea.vmem %s541_s25, 128  ;;  %p667_p3 = scmp.lt.s32.totalorder %s541_s25, %s541_s25 }
 0x2aa   :  { %573 = vmatprep.subr.bf16.mxu0 %v443_v55  ;;  %v436_v23 = vld [vmem:[#allocation2 + $0x20] sm:$0xff]  ;;  %v437_v58 = vld [vmem:[#allocation2 + $0x30] sm:$0xff]  ;;  %p663_p2 = scmp.ne.s32.totalorder %s541_s25, %s662_s28  ;;  %p668_p4 = scmp.lt.s32.totalorder %s662_s28, %s662_s28 }
 0x2ab   :  { %v446_v59 = vld [vmem:[#allocation2 + $0xc0] sm:$0xff]  ;;  %v447_v61 = vld [vmem:[#allocation2 + $0xd0] sm:$0xff] }
 0x2ac   :  { %v438_v60 = vld [vmem:[#allocation2 + $0x40] sm:$0xff]  ;;  %v439_v62 = vld [vmem:[#allocation2 + $0x50] sm:$0xff]  ;;  %p669_p5 = por %p668_p4, %p667_p3 }
 0x2ad   :  { %574 = vmatpush3.bf16.msra.mxu0 %v435_v56  ;;  %v448_v63 = vld [vmem:[#allocation2 + $0xe0] sm:$0xff]  ;;  %v449_v1 = vld [vmem:[#allocation2 + $0xf0] sm:$0xff] }
 0x2ae   :  { %575 = vmatprep.subr.bf16.mxu0 %v444_v21  ;;  %v440_v0 = vld [vmem:[#allocation2 + $0x60] sm:$0xff]  ;;  %v441_v2 = vld [vmem:[#allocation2 + $0x70] sm:$0xff]  ;;  %p670_p6 = pnand %p669_p5, %p663_p2 }
 0x2af   :  { %v566_v4 = vld [vmem:[%s900_s10] ss:$0 sm:$0xff] }
 0x2b0   :  { %v567_v31 = vld [vmem:[%s901_s11] ss:$0 sm:$0xff] }
 0x2b1   :  { %576 = vmatpush3.bf16.msra.mxu0 %v436_v23  ;;  %v568_v33 = vld [vmem:[%s902_s12] ss:$0 sm:$0xff] }
 0x2b2   :  { %577 = vmatprep.subr.bf16.mxu0 %v445_v57 }
 0x2b5   :  { %578 = vmatpush3.bf16.msra.mxu0 %v437_v58 }
 0x2b6   :  { %579 = vmatprep.subr.bf16.mxu0 %v446_v59 }
 0x2b9   :  { %580 = vmatpush3.bf16.msra.mxu0 %v438_v60 }
 0x2ba   :  { %581 = vmatprep.subr.bf16.mxu0 %v447_v61 }
 0x2bd   :  { %582 = vmatpush3.bf16.msra.mxu0 %v439_v62 }
 0x2be   :  { %583 = vmatprep.subr.bf16.mxu0 %v448_v63 }
 0x2c1   :  { %584 = vmatpush3.bf16.msra.mxu0 %v440_v0 }
 0x2c2   :  { %585 = vmatprep.subr.bf16.mxu0 %v449_v1 }
 0x2c5   :  { %586 = vmatpush3.bf16.msra.mxu0 %v441_v2 }
 0x2c8   :  { %492 = vmatmul.mubr.bf16.vlgmr.msra.gmra.mrb[4].mxu0 %v429_v51 }
 0x39b   :  { %v587_v3 = vpop.f32.mrb[4].mxu0 }
 0x39c   :  { %v588_v5 = vpop.f32.mrb[5].mxu0 }
 0x39d   :  { %v589_v6 = vadd.f32 %v588_v5, %v587_v3  ;;  %v590_v7 = vpop.f32.mrb[6].mxu0 }
 0x39e   :  { %v591_v8 = vpop.f32.mrb[7].mxu0 }
 0x39f   :  { %v494_v9 = vadd.f32 %v589_v6, %v566_v4 }
 0x3a1   :  { %v499_v10 = vmax.f32 %v494_v9, 0.0 }
 0x3a3   :  { %v500_v11 = vrot.slane %v499_v10, 4 }
 0x3a5   :  { %v501_v12 = vadd.f32 %v500_v11, %v499_v10 }
 0x3a7   :  { %v502_v13 = vrot.slane %v501_v12, 2 }
 0x3a9   :  { %v503_v14 = vadd.f32 %v502_v13, %v501_v12 }
 0x3ab   :  { %v504_v15 = vrot.slane %v503_v14, 1 }
 0x3ad   :  { %v505_v16 = vadd.f32 %v504_v15, %v503_v14 }
 0x3af   :  { %v506_v17 = vmul.f32 0.125, %v505_v16 }
 0x3b1   :  { %v507_v18 = vsub.f32 %v499_v10, %v506_v17 }
 0x3b3   :  { %v508_v19 = vmul.f32 %v507_v18, %v507_v18 }
 0x3b5   :  { %v509_v20 = vrot.slane %v508_v19, 4 }
 0x3b7   :  { %v510_v22 = vadd.f32 %v509_v20, %v508_v19 }
 0x3b9   :  { %v511_v24 = vrot.slane %v510_v22, 2 }
 0x3bb   :  { %v512_v25 = vadd.f32 %v511_v24, %v510_v22 }
 0x3bd   :  { %v513_v26 = vrot.slane %v512_v25, 1 }
 0x3bf   :  { %v514_v27 = vadd.f32 %v513_v26, %v512_v25 }
 0x3c1   :  { %v515_v28 = vmul.f32 0.125, %v514_v27 }
 0x3c3   :  { %v516_v29 = vadd.f32 1e-05, %v515_v28 }
 0x3c5   :  { %616 = vrsqrt.f32 %v516_v29 }
 0x3cf   :  { %v617_v30 = vpop.eup %616 }
 0x3d0   :  { %v518_v32 = vmul.f32 %v617_v30, %v507_v18 }
 0x3d2   :  { %v525_v34 = vmul.f32 %v567_v31, %v518_v32 }
 0x3d4   :  { %v532_v35 = vadd.f32 %v568_v33, %v525_v34 }
 0x3d6   :  { %533 = vst [vmem:[#allocation8] sm:$0xff] %v532_v35 }
 0x3d7   :  { %673 = shalt.err (!%p670_p6)
}
 0x3d8   :  { %s674_s26 = scalar_lea.hbm %s903_s13, 128 }
 0x3d9   :  { %p675_p7 = scmp.ne.s32.totalorder %s903_s13, %s674_s26  ;;  %p678_p8 = scmp.lt.u32.totalorder %s674_s26, %s903_s13 }
 0x3db   :  { %p680_p9 = pnand %p678_p8, %p675_p7 }
 0x3dd   :  { %683 = shalt.err (!%p680_p9)
}
 0x3de   :  { %543 = dma.vmem_to_hbm [thread:$0]  %s541_s25, 128, %s903_s13, [#allocation7]  }
 0x3df   :  { %692 = dma.done.wait [#allocation7], 128  }
 0x3e0   :  { %693 = vsyncadd [#allocation7], 4294967168 }
 0x3e1   :  { %547 = vsyncpa [#allocation6], 1 }
 0x3e2   :  { %548 = vsyncpa [#allocation7], 1 }
 0x3e3   :  { %549 = vsyncmov [#allocation4] }
 0x3e6   :  { %s550_s17 = vpop.sfrf %549 }
 0x3e7   :  { %p569_p10 = scmp.ne.s32.totalorder %s550_s17, 0 }
 0x3e9   :  { %554 = shalt.err (%p569_p10)  }
 0x3ea   :  { %556 = vsyncmov [#allocation4 + $0x1] }
 0x3ed   :  { %s557_s18 = vpop.sfrf %556 }
 0x3ee   :  { %p570_p11 = scmp.ne.s32.totalorder %s557_s18, 0 }
 0x3f0   :  { %561 = shalt.err (%p570_p11)  }

</bundles_post_ra>
